<compile_context>
chip_gen: v5e
topology: v5e:2x2
jax: 0.10.0
libtpu: 0.0.40
codegen_flags: <defaults>
</compile_context>

<pallas_src>
import functools
import math

import jax
import jax.numpy as jnp
from jax.experimental import pallas as pl
from jax.experimental.pallas import tpu as pltpu

_LANE = 128
_SUBLANE_F32 = 8
_MAX_BLOCK_ROWS = 4096            # (4096,128) f32 = 2 MiB per buffer
_VMEM_LIMIT_BYTES = 48 << 20      # covers 5 double-buffered 2 MiB streams, < v7x 64 MiB phys


# --------------------------------------------------------------------------------------
# helpers
# --------------------------------------------------------------------------------------
def _min_sublane(dtype):
    """Minimum sublane tile rows for a dtype: f32 -> 8, bf16 -> 16, int8/fp8 -> 32."""
    itemsize = jnp.dtype(dtype).itemsize
    return _SUBLANE_F32 * max(1, 4 // max(itemsize, 1))


def _num_tensorcores():
    """2 on dual-TensorCore chips (v7x), else 1.  Perf heuristic only (never affects math)."""
    try:
        kind = jax.devices()[0].device_kind.lower()
    except Exception:
        return 1
    return 2 if ("v7" in kind or "7x" in kind) else 1


def _slab_geometry(total, gran):
    """Flatten `total` elements into rows of 128 lanes, rows rounded up to `gran`."""
    tile = gran * _LANE
    if total > 0 and total % tile == 0:
        return total // _LANE, 0                         # zero-copy slab
    n_rows = pl.cdiv(pl.cdiv(total, _LANE), gran) * gran
    return n_rows, n_rows * _LANE - total


def _to_slab(a, dtype, n_rows, pad):
    flat = a.astype(dtype).reshape(-1)
    if pad:
        flat = jnp.pad(flat, (0, pad))
    return flat.reshape(n_rows, _LANE)


def _pick_block_rows(n_rows, gran):
    """Biggest block that fits VMEM; dual-TC chips get an even block count for balance."""
    num_tc = _num_tensorcores()
    n_blocks = pl.cdiv(n_rows, _MAX_BLOCK_ROWS)
    if num_tc >= 2 and n_rows > gran:
        n_blocks = max(n_blocks, num_tc)
        if n_blocks % num_tc:
            n_blocks += num_tc - (n_blocks % num_tc)
    else:
        n_blocks = max(n_blocks, 1)
    block_rows = pl.cdiv(pl.cdiv(n_rows, n_blocks), gran) * gran
    return min(block_rows, n_rows)


def _reset(mem, spike, threshold, reset_mechanism):
    if reset_mechanism == "subtract":
        return mem - spike.astype(mem.dtype) * threshold
    elif reset_mechanism == "zero":
        return jnp.where(spike, jnp.zeros_like(mem), mem)
    return mem


# --------------------------------------------------------------------------------------
# single-step kernels (matches BetaLIF.forward)
# --------------------------------------------------------------------------------------
def _beta_lif_kernel(x_ref, beta_ref, mem_ref, spike_ref, mem_out_ref,
                     *, threshold, reset_mechanism):
    mem = beta_ref[...] * mem_ref[...] + x_ref[...]
    spike = mem - threshold > 0.0                        # Heaviside (fast_sigmoid forward)
    spike_ref[...] = spike.astype(spike_ref.dtype)
    mem_out_ref[...] = _reset(mem, spike, threshold, reset_mechanism)


def _beta_lif_init_kernel(x_ref, spike_ref, mem_out_ref, *, threshold, reset_mechanism):
    # mem_prev == 0  =>  mem = beta * 0 + x = x  (beta / mem streams skipped entirely)
    mem = x_ref[...]
    spike = mem - threshold > 0.0
    spike_ref[...] = spike.astype(spike_ref.dtype)
    mem_out_ref[...] = _reset(mem, spike, threshold, reset_mechanism)


def beta_lif(input_current, beta, mem_prev=None, *, threshold=1.0,
             reset_mechanism="subtract", spike_dtype=None):
    """One BetaLIF step. input_current / beta / mem_prev share the same shape (e.g. NCHW)."""
    orig_shape = input_current.shape
    if mem_prev is None:
        compute_dtype = jnp.result_type(input_current, beta)
    else:
        compute_dtype = jnp.result_type(input_current, beta, mem_prev)
    spike_dtype = compute_dtype if spike_dtype is None else jnp.dtype(spike_dtype)

    total = math.prod(orig_shape)
    gran = max(_min_sublane(compute_dtype), _min_sublane(spike_dtype))
    n_rows, pad = _slab_geometry(total, gran)
    block_rows = _pick_block_rows(n_rows, gran)
    grid = (pl.cdiv(n_rows, block_rows),)
    spec = pl.BlockSpec((block_rows, _LANE), lambda i: (i, 0))

    itemsize = jnp.dtype(compute_dtype).itemsize
    spike_itemsize = jnp.dtype(spike_dtype).itemsize

    if mem_prev is None:
        kernel = functools.partial(_beta_lif_init_kernel, threshold=float(threshold),
                                   reset_mechanism=reset_mechanism)
        operands = (_to_slab(input_current, compute_dtype, n_rows, pad),)
        in_specs = [spec]
        io_aliases = {}
        bytes_accessed = n_rows * _LANE * (2 * itemsize + spike_itemsize)
    else:
        kernel = functools.partial(_beta_lif_kernel, threshold=float(threshold),
                                   reset_mechanism=reset_mechanism)
        operands = (_to_slab(input_current, compute_dtype, n_rows, pad),
                    _to_slab(beta, compute_dtype, n_rows, pad),
                    _to_slab(mem_prev, compute_dtype, n_rows, pad))
        in_specs = [spec, spec, spec]
        io_aliases = {2: 1}                              # donate mem_prev slab to mem_out
        bytes_accessed = n_rows * _LANE * (4 * itemsize + spike_itemsize)

    spike2, mem2 = pl.pallas_call(
        kernel,
        out_shape=(jax.ShapeDtypeStruct((n_rows, _LANE), spike_dtype),
                   jax.ShapeDtypeStruct((n_rows, _LANE), compute_dtype)),
        grid_spec=pltpu.PrefetchScalarGridSpec(
            num_scalar_prefetch=0, grid=grid,
            in_specs=in_specs, out_specs=[spec, spec]),
        input_output_aliases=io_aliases,
        cost_estimate=pl.CostEstimate(flops=4 * n_rows * _LANE,
                                      transcendentals=0,
                                      bytes_accessed=bytes_accessed),
        compiler_params=pltpu.CompilerParams(
            dimension_semantics=("parallel",),
            vmem_limit_bytes=_VMEM_LIMIT_BYTES),
    )(*operands)

    def _from_slab(s):
        if pad:
            return s.reshape(-1)[:total].reshape(orig_shape)
        return s.reshape(orig_shape)

    return _from_slab(spike2), _from_slab(mem2)


# --------------------------------------------------------------------------------------
# time-fused kernels: membrane carried in the resident output block, beta read once/block
# --------------------------------------------------------------------------------------
def _beta_lif_seq_kernel(x_ref, beta_ref, mem0_ref, spike_ref, mem_ref,
                         *, threshold, reset_mechanism):
    @pl.when(pl.program_id(1) == 0)
    def _():
        mem_ref[...] = mem0_ref[...]

    mem = beta_ref[...] * mem_ref[...] + x_ref[...]
    spike = mem - threshold > 0.0
    spike_ref[...] = spike.astype(spike_ref.dtype)
    mem_ref[...] = _reset(mem, spike, threshold, reset_mechanism)


def _beta_lif_seq_init_kernel(x_ref, beta_ref, spike_ref, mem_ref,
                              *, threshold, reset_mechanism):
    @pl.when(pl.program_id(1) == 0)
    def _():
        mem_ref[...] = jnp.zeros_like(mem_ref)

    mem = beta_ref[...] * mem_ref[...] + x_ref[...]
    spike = mem - threshold > 0.0
    spike_ref[...] = spike.astype(spike_ref.dtype)
    mem_ref[...] = _reset(mem, spike, threshold, reset_mechanism)


def beta_lif_sequence(input_current, beta, mem0=None, *, threshold=1.0,
                      reset_mechanism="subtract", spike_dtype=None):
    """Time-fused BetaLIF: input_current is [T, *feat], beta / mem0 are [*feat].

    Equivalent to calling beta_lif() T times with the carried membrane; returns
    (spikes[T, *feat], final_mem[*feat]).  Per timestep only x[t] is read and spike[t]
    written; the membrane stays resident in VMEM and beta is DMA'd once per row block.
    """
    T = input_current.shape[0]
    feat_shape = input_current.shape[1:]
    if mem0 is None:
        compute_dtype = jnp.result_type(input_current, beta)
    else:
        compute_dtype = jnp.result_type(input_current, beta, mem0)
    spike_dtype = compute_dtype if spike_dtype is None else jnp.dtype(spike_dtype)

    total = math.prod(feat_shape)
    gran = max(_min_sublane(compute_dtype), _min_sublane(spike_dtype))
    n_rows, pad = _slab_geometry(total, gran)
    block_rows = _pick_block_rows(n_rows, gran)
    n_row_blocks = pl.cdiv(n_rows, block_rows)
    grid = (n_row_blocks, T)

    def _to_seq_slab(a):
        flat = a.astype(compute_dtype).reshape(T, -1)
        if pad:
            flat = jnp.pad(flat, ((0, 0), (0, pad)))
        return flat.reshape(T, n_rows, _LANE)

    x_spec = pl.BlockSpec((None, block_rows, _LANE), lambda r, t: (t, r, 0))
    feat_spec = pl.BlockSpec((block_rows, _LANE), lambda r, t: (r, 0))  # t-invariant: 1 DMA/block

    itemsize = jnp.dtype(compute_dtype).itemsize
    spike_itemsize = jnp.dtype(spike_dtype).itemsize

    if mem0 is None:
        kernel = functools.partial(_beta_lif_seq_init_kernel, threshold=float(threshold),
                                   reset_mechanism=reset_mechanism)
        operands = (_to_seq_slab(input_current),
                    _to_slab(beta, compute_dtype, n_rows, pad))
        in_specs = [x_spec, feat_spec]
        io_aliases = {}
        bytes_accessed = n_rows * _LANE * (T * (itemsize + spike_itemsize) + 2 * itemsize)
    else:
        kernel = functools.partial(_beta_lif_seq_kernel, threshold=float(threshold),
                                   reset_mechanism=reset_mechanism)
        operands = (_to_seq_slab(input_current),
                    _to_slab(beta, compute_dtype, n_rows, pad),
                    _to_slab(mem0, compute_dtype, n_rows, pad))
        in_specs = [x_spec, feat_spec, feat_spec]
        io_aliases = {2: 1}                              # donate mem0 slab to final mem
        bytes_accessed = n_rows * _LANE * (T * (itemsize + spike_itemsize) + 3 * itemsize)

    spikes2, mem2 = pl.pallas_call(
        kernel,
        out_shape=(jax.ShapeDtypeStruct((T, n_rows, _LANE), spike_dtype),
                   jax.ShapeDtypeStruct((n_rows, _LANE), compute_dtype)),
        grid_spec=pltpu.PrefetchScalarGridSpec(
            num_scalar_prefetch=0, grid=grid,
            in_specs=in_specs,
            out_specs=[x_spec, feat_spec]),
        input_output_aliases=io_aliases,
        cost_estimate=pl.CostEstimate(flops=4 * T * n_rows * _LANE,
                                      transcendentals=0,
                                      bytes_accessed=bytes_accessed),
        compiler_params=pltpu.CompilerParams(
            dimension_semantics=("parallel", "arbitrary"),
            vmem_limit_bytes=_VMEM_LIMIT_BYTES),
    )(*operands)

    if pad:
        spikes = spikes2.reshape(T, -1)[:, :total].reshape((T,) + feat_shape)
        mem_fin = mem2.reshape(-1)[:total].reshape(feat_shape)
    else:
        spikes = spikes2.reshape((T,) + feat_shape)
        mem_fin = mem2.reshape(feat_shape)
    return spikes, mem_fin


# --------------------------------------------------------------------------------------
# pure-JAX reference + self-test
# --------------------------------------------------------------------------------------
def _beta_lif_ref(x, beta, mem_prev, threshold=1.0, reset_mechanism="subtract"):
    mem = beta * mem_prev + x
    spike = (mem - threshold > 0.0).astype(mem.dtype)
    if reset_mechanism == "subtract":
        mem_out = mem - spike * threshold
    elif reset_mechanism == "zero":
        mem_out = jnp.where(spike > 0, jnp.zeros_like(mem), mem)
    else:
        mem_out = mem
    return spike, mem_out


if __name__ == "__main__":
    key = jax.random.PRNGKey(0)
    k1, k2, k3, k4 = jax.random.split(key, 4)

    B, C, H, W = 2, 4, 16, 16          # NCHW conv-SNN feature map (tile-aligned)
    T = 8
    x = jax.random.normal(k1, (B, C, H, W), jnp.float32) * 1.5
    beta = jax.nn.sigmoid(jax.random.normal(k2, (B, C, H, W), jnp.float32))

    # --- single-step path (matches BetaLIF.forward) ---
    s1, m1 = beta_lif(x, beta, None, threshold=1.0, reset_mechanism="subtract")
    s2, m2 = beta_lif(x, beta, m1, threshold=1.0, reset_mechanism="subtract")
    s3, m3 = beta_lif(x, beta, m2, threshold=1.0, reset_mechanism="zero")
    jax.block_until_ready((s1, m1, s2, m2, s3, m3))

    zeros = jnp.zeros_like(x)
    rs1, rm1 = _beta_lif_ref(x, beta, zeros)
    rs2, rm2 = _beta_lif_ref(x, beta, rm1)
    rs3, rm3 = _beta_lif_ref(x, beta, rm2, reset_mechanism="zero")
    assert jnp.allclose(s1, rs1) and jnp.allclose(m1, rm1, atol=1e-6)
    assert jnp.allclose(s2, rs2) and jnp.allclose(m2, rm2, atol=1e-6)
    assert jnp.allclose(s3, rs3) and jnp.allclose(m3, rm3, atol=1e-6)

    # --- narrower spike output stream (bf16 spikes, values are exact 0/1) ---
    s2b, m2b = beta_lif(x, beta, m1, spike_dtype=jnp.bfloat16)
    jax.block_until_ready((s2b, m2b))
    assert jnp.allclose(s2b.astype(jnp.float32), rs2)
    assert jnp.allclose(m2b, rm2, atol=1e-6)

    # --- ragged (non tile-aligned) fallback ---
    xr = jax.random.normal(k3, (3, 5, 7), jnp.float32) * 1.5
    br = jax.nn.sigmoid(jax.random.normal(k3, (3, 5, 7), jnp.float32))
    mr = jnp.full((3, 5, 7), 0.5, jnp.float32)
    sr_k, mr_k = beta_lif(xr, br, mr, threshold=1.0, reset_mechanism="subtract")
    sr_r, mr_r = _beta_lif_ref(xr, br, mr)
    jax.block_until_ready((sr_k, mr_k))
    assert jnp.allclose(sr_k, sr_r) and jnp.allclose(mr_k, mr_r, atol=1e-6)

    # --- time-fused sequence: fresh state ---
    x_seq = jax.random.normal(k4, (T, B, C, H, W), jnp.float32) * 1.5
    sp_seq, mem_fin = beta_lif_sequence(x_seq, beta, None, threshold=1.0,
                                        reset_mechanism="subtract")
    jax.block_until_ready((sp_seq, mem_fin))
    mem_r = jnp.zeros_like(beta)
    for t in range(T):
        sp_r, mem_r = _beta_lif_ref(x_seq[t], beta, mem_r)
        assert jnp.allclose(sp_seq[t], sp_r)
    assert jnp.allclose(mem_fin, mem_r, atol=1e-5)

    # --- time-fused sequence: provided initial membrane + zero reset ---
    sp_seq2, mem_fin2 = beta_lif_sequence(x_seq, beta, m1, threshold=1.0,
                                          reset_mechanism="zero")
    jax.block_until_ready((sp_seq2, mem_fin2))
    mem_r = rm1
    for t in range(T):
        sp_r, mem_r = _beta_lif_ref(x_seq[t], beta, mem_r, reset_mechanism="zero")
        assert jnp.allclose(sp_seq2[t], sp_r)
    assert jnp.allclose(mem_fin2, mem_r, atol=1e-5)

    print("KERNEL_OK")
</pallas_src>

<mosaic_0001>
module attributes {stable_mosaic.version = 11 : i64} {
  func.func @_beta_lif_init_kernel(%arg0: i32, %arg1: memref<16x128xf32, #tpu.memory_space<vmem>>, %arg2: memref<16x128xf32, #tpu.memory_space<vmem>>, %arg3: memref<16x128xf32, #tpu.memory_space<vmem>>) attributes {dimension_semantics = [#tpu.dimension_semantics<parallel>], iteration_bounds = array<i64: 1>, scalar_prefetch = 0 : i64, scratch_operands = 0 : i64, tpu.core_type = #tpu.core_type<tc>, window_params = [{transform_indices = @transform_0, window_bounds = array<i64: 16, 128>}, {transform_indices = @transform_1, window_bounds = array<i64: 16, 128>}, {transform_indices = @transform_2, window_bounds = array<i64: 16, 128>}]} {
    %c0 = arith.constant 0 : index
    %c0_0 = arith.constant 0 : index
    %0 = vector.load %arg1[%c0, %c0_0] : memref<16x128xf32, #tpu.memory_space<vmem>>, vector<16x128xf32>
    %cst = arith.constant 1.000000e+00 : f32
    %1 = vector.broadcast %cst : f32 to vector<16x128xf32>
    %2 = arith.subf %0, %1 : vector<16x128xf32>
    %cst_1 = arith.constant 0.000000e+00 : f32
    %3 = vector.broadcast %cst_1 : f32 to vector<16x128xf32>
    %4 = arith.cmpf ogt, %2, %3 : vector<16x128xf32>
    %5 = arith.extui %4 : vector<16x128xi1> to vector<16x128xi32>
    %6 = arith.sitofp %5 : vector<16x128xi32> to vector<16x128xf32>
    %c0_2 = arith.constant 0 : index
    %c0_3 = arith.constant 0 : index
    %7 = vector.load %arg2[%c0_2, %c0_3] : memref<16x128xf32, #tpu.memory_space<vmem>>, vector<16x128xf32>
    tpu.vector_store %arg2[%c0_2, %c0_3], %6 {strides = array<i32>} : memref<16x128xf32, #tpu.memory_space<vmem>>, vector<16x128xf32>,
    %8 = arith.extui %4 : vector<16x128xi1> to vector<16x128xi32>
    %9 = arith.sitofp %8 : vector<16x128xi32> to vector<16x128xf32>
    %cst_4 = arith.constant 1.000000e+00 : f32
    %10 = vector.broadcast %cst_4 : f32 to vector<16x128xf32>
    %11 = arith.mulf %9, %10 : vector<16x128xf32>
    %12 = arith.subf %0, %11 : vector<16x128xf32>
    %c0_5 = arith.constant 0 : index
    %c0_6 = arith.constant 0 : index
    %13 = vector.load %arg3[%c0_5, %c0_6] : memref<16x128xf32, #tpu.memory_space<vmem>>, vector<16x128xf32>
    tpu.vector_store %arg3[%c0_5, %c0_6], %12 {strides = array<i32>} : memref<16x128xf32, #tpu.memory_space<vmem>>, vector<16x128xf32>,
    return
  }
  func.func @transform_0(%arg0: i32) -> (i32, i32) {
    %c0_i32 = arith.constant 0 : i32
    %c0_i32_0 = arith.constant 0 : i32
    return %arg0, %c0_i32 : i32, i32
  }
  func.func @transform_1(%arg0: i32) -> (i32, i32) {
    %c0_i32 = arith.constant 0 : i32
    %c0_i32_0 = arith.constant 0 : i32
    return %arg0, %c0_i32 : i32, i32
  }
  func.func @transform_2(%arg0: i32) -> (i32, i32) {
    %c0_i32 = arith.constant 0 : i32
    %c0_i32_0 = arith.constant 0 : i32
    return %arg0, %c0_i32 : i32, i32
  }
}

</mosaic_0001>

<bundles_post_ra>
// kernel: tpu_custom_call.1
= control target key start
LH: loop header
LB: loop body
LE: loop exit
PB: predicated region body
PF: predicated region fallthrough
CT: control target
= control target key end

     0   :  { %8 = vsyncpa [#allocation3], 0  ;;  %s208_s0 = inlined_call_operand.hbm [shape: f32[16,128], index: 0, kind: input, shape index: {}]   ;;  %s209_s1 = inlined_call_operand.hbm [shape: f32[16,128], index: 1, kind: output, shape index: {0}]   ;;  %s210_s2 = inlined_call_operand.hbm [shape: f32[16,128], index: 2, kind: output, shape index: {1}]  }
   0x1   :  { %9 = vsyncpa [#allocation4], 0 }
   0x2   :  { %10 = vsyncpa [#allocation7], 0  ;;  %s15_s11 = sshll.u32 %s208_s0, 4  ;;  %s169_s12 = smov [#allocation2]   ;;  %s16_s11 = int_to_ptr.hbm [resolvable:$true] %s15_s11 }
   0x3   :  { %s17_s13 = sshll.u32 %s169_s12, 4  ;;  %s170_s14 = smov 128   ;;  %s18_s13 = int_to_ptr.vmem [resolvable:$true] %s17_s13 }
   0x4   :  { %s171_s15 = smov 8  }
   0x5   :  { %23 = dma.hbm_to_vmem [thread:$0]  %s16_s11, 256, %s18_s13, [#allocation3], %s170_s14, %s170_s14, %s171_s15  }
   0x6   :  { %163 = dma.done.wait [#allocation3], 256  }
   0x7   :  { %164 = vsyncadd [#allocation3], 4294967040  ;;  %v28_v0 = vld [vmem:[#allocation2] sm:$0xff]  ;;  %v29_v1 = vld [vmem:[#allocation2 + $0x8] sm:$0xff]  ;;  %s172_s16 = smov [#allocation5]   ;;  %s50_s19 = sshll.u32 %s209_s1, 4  ;;  %s51_s19 = int_to_ptr.hbm [resolvable:$true] %s50_s19 }
   0x8   :  { %v81_v2 = vadd.f32 -1.0, %v28_v0  ;;  %v82_v3 = vadd.f32 -1.0, %v29_v1  ;;  %s48_s17 = sshll.u32 %s172_s16, 4  ;;  %s173_s20 = smov [#allocation6]   ;;  %v174_v4 = vmov 0.0   ;;  %s49_s17 = int_to_ptr.vmem [resolvable:$true] %s48_s17 }
   0x9   :  { %s61_s21 = sshll.u32 %s173_s20, 4  ;;  %s63_s24 = sshll.u32 %s210_s2, 4  ;;  %s62_s21 = int_to_ptr.vmem [resolvable:$true] %s61_s21  ;;  %s64_s24 = int_to_ptr.hbm [resolvable:$true] %s63_s24 }
   0xa   :  { %vm32_vm0 = vcmp.gt.f32.partialorder %v81_v2, 0.0  ;;  %vm33_vm1 = vcmp.gt.f32.partialorder %v82_v3, 0.0 }
   0xb   :  { %v83_v5 = vsel %vm32_vm0, 1.0, %v174_v4  ;;  %v84_v6 = vsel %vm33_vm1, 1.0, %v174_v4 }
   0xc   :  { %38 = vst [vmem:[#allocation5] sm:$0xff] %v83_v5  ;;  %v40_v7 = vsub.f32 %v28_v0, %v83_v5  ;;  %v41_v8 = vsub.f32 %v29_v1, %v84_v6 }
   0xd   :  { %39 = vst [vmem:[#allocation5 + $0x8] sm:$0xff] %v84_v6 }
   0xe   :  { %42 = vst [vmem:[#allocation6] sm:$0xff] %v40_v7  ;;  %56 = dma.vmem_to_hbm [thread:$0]  %s49_s17, 256, %s51_s19, [#allocation4], %s170_s14, %s170_s14, %s171_s15  }
   0xf   :  { %43 = vst [vmem:[#allocation6 + $0x8] sm:$0xff] %v41_v8 }
  0x10   :  { %69 = dma.vmem_to_hbm [thread:$0]  %s62_s21, 256, %s64_s24, [#allocation7], %s170_s14, %s170_s14, %s171_s15  }
  0x11   :  { %165 = dma.done.wait [#allocation4], 256  }
  0x12   :  { %166 = vsyncadd [#allocation4], 4294967040 }
  0x13   :  { %167 = dma.done.wait [#allocation7], 256  }
  0x14   :  { %168 = vsyncadd [#allocation7], 4294967040 }
  0x15   :  { %78 = vsyncpa [#allocation3], 1 }
  0x16   :  { %79 = vsyncpa [#allocation4], 1 }
  0x17   :  { %80 = vsyncpa [#allocation7], 1 }

</bundles_post_ra>
